<compile_context>
chip_gen: v7x
topology: tpu7x:2x2x1
jax: 0.10.0
libtpu: 0.0.40
codegen_flags: <defaults>
</compile_context>

<pallas_src>
import jax
import jax.numpy as jnp
from jax.experimental import pallas as pl
from jax.experimental.pallas import tpu as pltpu

IN_DIM = 128   # fc in_features
OUT_DIM = 24   # fc out_features


def img_ori_kernel(x_ref, w_ref, b_ref, out_ref):
    # relu -> (dropout = identity in eval mode) -> linear
    x = jnp.maximum(x_ref[...], 0.0)
    out = jnp.dot(x, w_ref[...], preferred_element_type=jnp.float32) + b_ref[...]
    out_ref[...] = out.astype(out_ref.dtype)


def img_ori_net_forward(x, w, b, *, block_b: int = 1024):
    """x: (B, 128).  w: (128, 24) pre-transposed.  b: (1, 24).

    Returns out: (B, 24) float32.
    """
    B = x.shape[0]

    # Batch tile: large enough to amortize per-step overhead, small enough to
    # keep VMEM use tiny on every TPU generation.  Must be a multiple of 8
    # (sublane) unless it covers the full batch.
    tb = min(block_b, B)
    if tb != B:
        tb = max(8, (tb // 8) * 8)
    grid = (pl.cdiv(B, tb),)

    return pl.pallas_call(
        img_ori_kernel,
        out_shape=jax.ShapeDtypeStruct((B, OUT_DIM), jnp.float32),
        grid=grid,
        in_specs=[
            pl.BlockSpec((tb, IN_DIM), lambda i: (i, 0)),     # x tile
            pl.BlockSpec((IN_DIM, OUT_DIM), lambda i: (0, 0)),  # W (resident)
            pl.BlockSpec((1, OUT_DIM), lambda i: (0, 0)),       # b (resident)
        ],
        out_specs=pl.BlockSpec((tb, OUT_DIM), lambda i: (i, 0)),
        compiler_params=pltpu.CompilerParams(
            dimension_semantics=("parallel",),
        ),
    )(x, w, b)


def init_params(key):
    """Deterministic init matching torch.nn.Linear's U(-1/sqrt(fan_in), 1/sqrt(fan_in))."""
    k1, k2 = jax.random.split(key, 2)
    bound = 1.0 / (IN_DIM ** 0.5)
    # Stored transposed: (in_features, out_features)
    w = jax.random.uniform(k1, (IN_DIM, OUT_DIM), jnp.float32, -bound, bound)
    b = jax.random.uniform(k2, (1, OUT_DIM), jnp.float32, -bound, bound)
    return w, b


if __name__ == "__main__":
    key = jax.random.PRNGKey(0)
    k_x, k_p = jax.random.split(key)

    B = 8
    x = jax.random.normal(k_x, (B, IN_DIM), jnp.float32)
    w, b = init_params(k_p)

    out = jax.block_until_ready(img_ori_net_forward(x, w, b))

    # Reference check in plain JAX (eval-mode dropout == identity).
    ref = jnp.maximum(x, 0.0) @ w + b
    assert out.shape == (B, OUT_DIM)
    assert jnp.allclose(out, ref, atol=1e-5), "output mismatch"

    print("KERNEL_OK")
</pallas_src>

<mosaic_0001>
module attributes {stable_mosaic.version = 11 : i64} {
  func.func @img_ori_kernel(%arg0: i32, %arg1: memref<8x128xf32, #tpu.memory_space<vmem>>, %arg2: memref<128x24xf32, #tpu.memory_space<vmem>>, %arg3: memref<1x24xf32, #tpu.memory_space<vmem>>, %arg4: memref<8x24xf32, #tpu.memory_space<vmem>>) attributes {dimension_semantics = [#tpu.dimension_semantics<parallel>], iteration_bounds = array<i64: 1>, scalar_prefetch = 0 : i64, scratch_operands = 0 : i64, tpu.core_type = #tpu.core_type<tc>, window_params = [{transform_indices = @transform_0, window_bounds = array<i64: 8, 128>}, {pipeline_mode = #tpu.pipeline_mode<synchronous>, transform_indices = @transform_1, window_bounds = array<i64: 128, 24>}, {pipeline_mode = #tpu.pipeline_mode<synchronous>, transform_indices = @transform_2, window_bounds = array<i64: 1, 24>}, {transform_indices = @transform_3, window_bounds = array<i64: 8, 24>}]} {
    %c0 = arith.constant 0 : index
    %c0_0 = arith.constant 0 : index
    %0 = vector.load %arg1[%c0, %c0_0] : memref<8x128xf32, #tpu.memory_space<vmem>>, vector<8x128xf32>
    %cst = arith.constant 0.000000e+00 : f32
    %1 = vector.broadcast %cst : f32 to vector<8x128xf32>
    %2 = arith.maximumf %0, %1 : vector<8x128xf32>
    %c0_1 = arith.constant 0 : index
    %c0_2 = arith.constant 0 : index
    %3 = vector.load %arg2[%c0_1, %c0_2] : memref<128x24xf32, #tpu.memory_space<vmem>>, vector<128x24xf32>
    %cst_3 = arith.constant dense<0.000000e+00> : vector<8x24xf32>
    %4 = tpu.matmul %2, %3, %cst_3 {dimension_numbers = #tpu.dot_dimension_numbers<[1], [0], [0], [1], [0, 0, 1, 1], [], []>} : vector<8x128xf32>, vector<128x24xf32>, vector<8x24xf32> -> vector<8x24xf32>
    %c0_4 = arith.constant 0 : index
    %c0_5 = arith.constant 0 : index
    %5 = vector.load %arg3[%c0_4, %c0_5] : memref<1x24xf32, #tpu.memory_space<vmem>>, vector<1x24xf32>
    %6 = vector.broadcast %5 : vector<1x24xf32> to vector<8x24xf32>
    %7 = arith.addf %4, %6 : vector<8x24xf32>
    %c0_6 = arith.constant 0 : index
    %c0_7 = arith.constant 0 : index
    %8 = vector.load %arg4[%c0_6, %c0_7] : memref<8x24xf32, #tpu.memory_space<vmem>>, vector<8x24xf32>
    tpu.vector_store %arg4[%c0_6, %c0_7], %7 {strides = array<i32>} : memref<8x24xf32, #tpu.memory_space<vmem>>, vector<8x24xf32>,
    return
  }
  func.func @transform_0(%arg0: i32) -> (i32, i32) {
    %c0_i32 = arith.constant 0 : i32
    %c0_i32_0 = arith.constant 0 : i32
    return %arg0, %c0_i32 : i32, i32
  }
  func.func @transform_1(%arg0: i32) -> (i32, i32) {
    %c0_i32 = arith.constant 0 : i32
    %c0_i32_0 = arith.constant 0 : i32
    %c0_i32_1 = arith.constant 0 : i32
    return %c0_i32, %c0_i32_0 : i32, i32
  }
  func.func @transform_2(%arg0: i32) -> (i32, i32) {
    %c0_i32 = arith.constant 0 : i32
    %c0_i32_0 = arith.constant 0 : i32
    %c0_i32_1 = arith.constant 0 : i32
    return %c0_i32, %c0_i32_0 : i32, i32
  }
  func.func @transform_3(%arg0: i32) -> (i32, i32) {
    %c0_i32 = arith.constant 0 : i32
    %c0_i32_0 = arith.constant 0 : i32
    return %arg0, %c0_i32 : i32, i32
  }
}

</mosaic_0001>

<bundles_post_ra>
// kernel: tpu_custom_call.1
= control target key start
LH: loop header
LB: loop body
LE: loop exit
PB: predicated region body
PF: predicated region fallthrough
CT: control target
= control target key end

     0   :  { %v231_v3 = vmov 0.0|0.0   ;;  %vm232_vm0 = vmmov 0   ;;  %v233_v6 = vmov 0.0   ;;  %s321_s0 = inlined_call_operand.vmem [shape: f32[8,128], index: 0, kind: input, shape index: {}]   ;;  %s322_s1 = inlined_call_operand.vmem [shape: f32[128,24], index: 1, kind: input, shape index: {}]   ;;  %s323_s2 = inlined_call_operand.vmem [shape: f32[1,24], index: 2, kind: input, shape index: {}]   ;;  %s324_s3 = inlined_call_operand.hbm [shape: f32[8,24], index: 3, kind: output, shape index: {}]  }
   0x1   :  { %v17_v0 = vld [vmem:[%s322_s1] sm:$0xff]  ;;  %v18_v1 = vld [vmem:[%s322_s1 + $0x8] sm:$0xff]  ;;  %v19_v2 = vld [vmem:[%s322_s1 + $0x10] sm:$0xff]  ;;  %179 = vmatprep.subr.bf16.mxu0 %v231_v3  ;;  %176 = vmatprep.mubr.msk.f32.mxu0 %vm232_vm0, %v233_v6 }
   0x2   :  { %v180_v4 = vpack.c.bf16 %v18_v1, %v17_v0  ;;  %v20_v5 = vld [vmem:[%s322_s1 + $0x18] sm:$0xff]  ;;  %v21_v8 = vld [vmem:[%s322_s1 + $0x20] sm:$0xff]  ;;  %v22_v9 = vld [vmem:[%s322_s1 + $0x28] sm:$0xff] }
   0x3   :  { %v183_v7 = vpack.c.bf16 %v20_v5, %v19_v2 }
   0x4   :  { %181 = vmatpush3.bf16.msra.mxu0 %v180_v4 }
   0x5   :  { %182 = vmatprep.subr.bf16.mxu0 %v231_v3 }
   0x6   :  { %8 = vsyncpa [#allocation3], 0  ;;  %v186_v10 = vpack.c.bf16 %v22_v9, %v21_v8  ;;  %v23_v11 = vld [vmem:[%s322_s1 + $0x30] sm:$0xff]  ;;  %v24_v12 = vld [vmem:[%s322_s1 + $0x38] sm:$0xff]  ;;  %s234_s21 = smov [#allocation2]   ;;  %vm110_vm1 = vcmask 195584  }
   0x7   :  { %v189_v13 = vpack.c.bf16 %v24_v12, %v23_v11  ;;  %v25_v14 = vld [vmem:[%s322_s1 + $0x40] sm:$0xff]  ;;  %v26_v15 = vld [vmem:[%s322_s1 + $0x48] sm:$0xff]  ;;  %v27_v17 = vld [vmem:[%s322_s1 + $0x50] sm:$0xff]  ;;  %s118_s22 = sshll.u32 %s234_s21, 4  ;;  %s119_s22 = int_to_ptr.vmem [resolvable:$true] %s118_s22 }
   0x8   :  { %184 = vmatpush3.bf16.msra.mxu0 %v183_v7  ;;  %v192_v16 = vpack.c.bf16 %v26_v15, %v25_v14  ;;  %v28_v18 = vld [vmem:[%s322_s1 + $0x58] sm:$0xff]  ;;  %v29_v20 = vld [vmem:[%s322_s1 + $0x60] sm:$0xff]  ;;  %v30_v21 = vld [vmem:[%s322_s1 + $0x68] sm:$0xff]  ;;  %p212_p1 = scmp.lt.s32.totalorder %s119_s22, %s119_s22 }
   0x9   :  { %185 = vmatprep.subr.bf16.mxu0 %v231_v3  ;;  %v195_v19 = vpack.c.bf16 %v28_v18, %v27_v17  ;;  %v198_v22 = vpack.c.bf16 %v30_v21, %v29_v20  ;;  %v31_v23 = vld [vmem:[%s322_s1 + $0x70] sm:$0xff]  ;;  %v32_v24 = vld [vmem:[%s322_s1 + $0x78] sm:$0xff]  ;;  %v15_v26 = vld [vmem:[%s321_s0] sm:$0xff]  ;;  %s207_s1 = scalar_lea.vmem %s119_s22, 128 }
   0xa   :  { %v201_v25 = vpack.c.bf16 %v32_v24, %v31_v23  ;;  %v16_v27 = vmax.f32 %v15_v26, 0.0  ;;  %v126_v28 = vld [vmem:[%s323_s2] ss:$0 sm:$0xff]  ;;  %p208_p0 = scmp.ne.s32.totalorder %s119_s22, %s207_s1  ;;  %p213_p2 = scmp.lt.s32.totalorder %s207_s1, %s207_s1 }
   0xc   :  { %187 = vmatpush3.bf16.msra.mxu0 %v186_v10  ;;  %p214_p3 = por %p213_p2, %p212_p1 }
   0xd   :  { %188 = vmatprep.subr.bf16.mxu0 %v231_v3 }
   0xe   :  { %p215_p4 = pnand %p214_p3, %p208_p0 }
  0x10   :  { %190 = vmatpush3.bf16.msra.mxu0 %v189_v13 }
  0x11   :  { %191 = vmatprep.subr.bf16.mxu0 %v231_v3 }
  0x14   :  { %193 = vmatpush3.bf16.msra.mxu0 %v192_v16 }
  0x15   :  { %194 = vmatprep.subr.bf16.mxu0 %v231_v3 }
  0x18   :  { %196 = vmatpush3.bf16.msra.mxu0 %v195_v19 }
  0x19   :  { %197 = vmatprep.subr.bf16.mxu0 %v231_v3 }
  0x1c   :  { %199 = vmatpush3.bf16.msra.mxu0 %v198_v22 }
  0x1d   :  { %200 = vmatprep.subr.bf16.mxu0 %v231_v3 }
  0x20   :  { %202 = vmatpush3.bf16.msra.mxu0 %v201_v25 }
  0x23   :  { %177 = vmatmul.mubr.f32.vlgmr.msra.gmra.mrb[0].mxu0 %v16_v27 }
  0xf6   :  { %v106_v29 = vpop.f32.mrb[0].mxu0 }
  0xf7   :  { %v107_v30 = vadd.f32 %v126_v28, %v106_v29  ;;  %v178_v31 = vpop.f32.mrb[1].mxu0 }
  0xf9   :  { %111 = vst.msk [vmem:[#allocation2] sm:$0xff] %vm110_vm1, %v107_v30 }
  0xfa   :  { %218 = shalt.err (!%p215_p4)
}
  0xfb   :  { %s219_s24 = scalar_lea.hbm %s324_s3, 128 }
  0xfc   :  { %p220_p5 = scmp.ne.s32.totalorder %s324_s3, %s219_s24  ;;  %p223_p6 = scmp.lt.u32.totalorder %s219_s24, %s324_s3 }
  0xfe   :  { %p225_p7 = pnand %p223_p6, %p220_p5 }
 0x100   :  { %228 = shalt.err (!%p225_p7)
}
 0x101   :  { %121 = dma.vmem_to_hbm [thread:$0]  %s119_s22, 128, %s324_s3, [#allocation3]  }
 0x102   :  { %229 = dma.done.wait [#allocation3], 128  }
 0x103   :  { %230 = vsyncadd [#allocation3], 4294967168 }
 0x104   :  { %125 = vsyncpa [#allocation3], 1 }

</bundles_post_ra>
